<compile_context>
chip_gen: v5e
topology: v5e:2x2
jax: 0.10.0
libtpu: 0.0.40
codegen_flags: <defaults>
</compile_context>

<pallas_src>
import functools

import jax
import jax.numpy as jnp
from jax.experimental import pallas as pl
from jax.experimental.pallas import tpu as pltpu


def _round_up(x: int, m: int) -> int:
    return ((x + m - 1) // m) * m


def _cdiv(a: int, b: int) -> int:
    return (a + b - 1) // b


def _sublane(dtype) -> int:
    # Minimum sublane granularity: f32 -> 8, bf16 -> 16, int8/fp8 -> 32.
    return 8 * (4 // jnp.dtype(dtype).itemsize)


def _chip_vmem_bytes() -> int:
    try:
        info = pltpu.get_tpu_info()
        vmem = getattr(info, "vmem_capacity_bytes", None)
        if vmem:
            return int(vmem)
    except Exception:
        pass
    return 64 * 1024 * 1024  # conservative (v7x-sized) fallback


_VMEM_BYTES = _chip_vmem_bytes()
if _VMEM_BYTES >= 100 * 1024 * 1024:
    # v5e / v6e: 128 MiB VMEM -> large batch tiles to get MXU-bound.
    _TM_MAX = 1024
    _VMEM_LIMIT = 100 * 1024 * 1024
else:
    # v7x: 64 MiB VMEM per TensorCore -> smaller tiles, keep >=2 parallel tiles.
    _TM_MAX = 512
    _VMEM_LIMIT = 52 * 1024 * 1024


# ----------------------------------------------------------------------------
# Kernels: one (batch tile i, hidden chunk k) step of fc1 -> ReLU -> fc2.
# Grid = (B_p // tm, H_p // th); hidden axis is last and "arbitrary".
# ----------------------------------------------------------------------------
def _ffn_kernel_accum_out(x_ref, w1_ref, b1_ref, w2_ref, b2_ref, o_ref):
    """f32 output: accumulate fc2 partials directly into the resident out tile."""
    k = pl.program_id(1)

    @pl.when(k == 0)
    def _():
        o_ref[...] = jnp.zeros_like(o_ref)

    # fc1 slab on the bf16 MXU path, f32 accumulate, + b1, ReLU.
    h = jnp.dot(x_ref[...].astype(w1_ref.dtype), w1_ref[...],
                preferred_element_type=jnp.float32)
    h = jnp.maximum(h + b1_ref[...], 0.0)

    # fc2 partial accumulated into the VMEM-resident output tile.
    o_ref[...] += jnp.dot(h.astype(w2_ref.dtype), w2_ref[...],
                          preferred_element_type=jnp.float32)

    @pl.when(k == pl.num_programs(1) - 1)
    def _():
        o_ref[...] += b2_ref[...]


def _ffn_kernel_scratch(x_ref, w1_ref, b1_ref, w2_ref, b2_ref, o_ref, acc_ref):
    """Non-f32 output: accumulate in f32 scratch, add b2 + cast + store once."""
    k = pl.program_id(1)

    @pl.when(k == 0)
    def _():
        acc_ref[...] = jnp.zeros_like(acc_ref)

    h = jnp.dot(x_ref[...].astype(w1_ref.dtype), w1_ref[...],
                preferred_element_type=jnp.float32)
    h = jnp.maximum(h + b1_ref[...], 0.0)
    acc_ref[...] += jnp.dot(h.astype(w2_ref.dtype), w2_ref[...],
                            preferred_element_type=jnp.float32)

    @pl.when(k == pl.num_programs(1) - 1)
    def _():
        o_ref[...] = (acc_ref[...] + b2_ref[...]).astype(o_ref.dtype)


# ----------------------------------------------------------------------------
# One-time parameter preparation (out of the per-call hot path).
# ----------------------------------------------------------------------------
def prepare_ffn_params(w1, b1, w2, b2, *, th=512, weight_dtype=jnp.bfloat16):
    """Transpose / pad / cast nn.Linear parameters ONCE at load time.

    PyTorch layout: w1 [hidden, d_in], b1 [hidden], w2 [d_out, hidden], b2 [d_out].
    """
    hidden, d_in = w1.shape
    d_out = w2.shape[0]

    th = min(th, _round_up(hidden, 128))
    H_p = _round_up(hidden, th)
    d_out_p = _round_up(d_out, 128)  # lane-dense (unmasked) output stores

    # Zero-padding is exact: padded hidden cols give relu(0 + 0) = 0 and hit
    # zero w2 rows; padded output cols / batch rows are sliced off afterwards.
    w1_t = jnp.asarray(w1).T.astype(weight_dtype)                 # [d_in, hidden]
    w2_t = jnp.asarray(w2).T.astype(weight_dtype)                 # [hidden, d_out]
    w1_p = jnp.pad(w1_t, ((0, 0), (0, H_p - hidden)))
    w2_p = jnp.pad(w2_t, ((0, H_p - hidden), (0, d_out_p - d_out)))
    b1_p = jnp.pad(jnp.asarray(b1, jnp.float32), (0, H_p - hidden)).reshape(1, H_p)
    b2_p = jnp.pad(jnp.asarray(b2, jnp.float32), (0, d_out_p - d_out)).reshape(1, d_out_p)

    return dict(w1=w1_p, b1=b1_p, w2=w2_p, b2=b2_p,
                th=th, d_in=d_in, hidden=hidden, d_out=d_out)


def _select_tm(B, d_in, th, d_out_p, x_dtype, w_dtype):
    """Pick a batch tile: VMEM-budgeted, dtype-aware sublane, bounded padding."""
    sub = _sublane(x_dtype)
    x_b = jnp.dtype(x_dtype).itemsize
    w_b = jnp.dtype(w_dtype).itemsize
    use_scratch = jnp.dtype(x_dtype) != jnp.dtype(jnp.float32)

    # Fixed per-step VMEM: double-buffered weight / bias tiles.
    fixed = 2 * (d_in * th + th * d_out_p) * w_b + 2 * (th + d_out_p) * 4
    # Per batch-row VMEM: double-buffered x & out tiles (+ f32 scratch if any).
    per_row = 2 * d_in * x_b + 2 * d_out_p * x_b + (4 * d_out_p if use_scratch else 0)

    budget = int(_VMEM_LIMIT * 0.85) - fixed
    tm_fit = sub
    if budget > per_row * sub:
        tm_fit = max(sub, (budget // per_row) // sub * sub)
    tm_cap = max(sub, min(_round_up(_TM_MAX, sub), tm_fit))

    n_tiles = _cdiv(B, tm_cap)
    # v7x has 2 TensorCores sharing the chip: keep >=2 parallel batch tiles.
    if n_tiles == 1 and _VMEM_BYTES < 100 * 1024 * 1024 and B >= 2 * sub:
        n_tiles = 2
    return _round_up(_cdiv(B, n_tiles), sub)


# ----------------------------------------------------------------------------
# Jitted pallas_call wrapper.
# ----------------------------------------------------------------------------
@functools.partial(jax.jit, static_argnames=("tm", "th", "d_out"))
def _ffn_pallas(x, w1_p, b1_p, w2_p, b2_p, *, tm, th, d_out):
    B, d_in = x.shape
    H_p = w1_p.shape[1]
    d_out_p = w2_p.shape[1]
    B_p = _round_up(B, tm)

    x_p = jnp.pad(x, ((0, B_p - B), (0, 0))) if B_p != B else x
    out_dtype = x.dtype
    use_scratch = jnp.dtype(out_dtype) != jnp.dtype(jnp.float32)

    kernel = _ffn_kernel_scratch if use_scratch else _ffn_kernel_accum_out
    scratch = [pltpu.VMEM((tm, d_out_p), jnp.float32)] if use_scratch else []

    grid = (B_p // tm, H_p // th)

    flops = 2 * B_p * H_p * (d_in + d_out_p)
    bytes_accessed = (
        B_p * d_in * x_p.dtype.itemsize
        + w1_p.size * w1_p.dtype.itemsize
        + w2_p.size * w2_p.dtype.itemsize
        + b1_p.size * b1_p.dtype.itemsize
        + b2_p.size * b2_p.dtype.itemsize
        + B_p * d_out_p * jnp.dtype(out_dtype).itemsize
    )

    out_p = pl.pallas_call(
        kernel,
        out_shape=jax.ShapeDtypeStruct((B_p, d_out_p), out_dtype),
        grid_spec=pltpu.PrefetchScalarGridSpec(
            num_scalar_prefetch=0,
            grid=grid,
            in_specs=[
                # x tile: constant over the hidden (k) axis -> stays resident.
                pl.BlockSpec((tm, d_in), lambda i, k: (i, 0)),
                # fc1 weight / bias: hidden chunk k.
                pl.BlockSpec((d_in, th), lambda i, k: (0, k)),
                pl.BlockSpec((1, th), lambda i, k: (0, k)),
                # fc2 weight: hidden chunk k, full (padded) output width.
                pl.BlockSpec((th, d_out_p), lambda i, k: (k, 0)),
                # fc2 bias: constant -> DMA'd once, resident in VMEM.
                pl.BlockSpec((1, d_out_p), lambda i, k: (0, 0)),
            ],
            # Output tile resident across the hidden reduction axis.
            out_specs=pl.BlockSpec((tm, d_out_p), lambda i, k: (i, 0)),
            scratch_shapes=scratch,
        ),
        compiler_params=pltpu.CompilerParams(
            dimension_semantics=("parallel", "arbitrary"),
            vmem_limit_bytes=_VMEM_LIMIT,
        ),
        cost_estimate=pl.CostEstimate(
            flops=flops, transcendentals=0, bytes_accessed=bytes_accessed),
    )(x_p, w1_p, b1_p, w2_p, b2_p)

    return out_p[:B, :d_out]


def feed_forward(x, params):
    """relu(x @ W1.T + b1) @ W2.T + b2 — the PyTorch FeedForward.forward."""
    tm = _select_tm(x.shape[0], params["d_in"], params["th"],
                    params["w2"].shape[1], x.dtype, params["w1"].dtype)
    return _ffn_pallas(x, params["w1"], params["b1"], params["w2"], params["b2"],
                       tm=tm, th=params["th"], d_out=params["d_out"])


if __name__ == "__main__":
    # Small shapes implied by the module: input_dim=16, hidden_dim=32, output_dim=8.
    batch, input_dim, hidden_dim, output_dim = 8, 16, 32, 8

    key = jax.random.PRNGKey(0)
    kx, kw1, kb1, kw2, kb2 = jax.random.split(key, 5)

    # Deterministic init mimicking nn.Linear's U(-1/sqrt(fan_in), 1/sqrt(fan_in)),
    # stored in PyTorch layout (W1: [hidden, in], W2: [out, hidden]).
    lim1 = 1.0 / jnp.sqrt(input_dim)
    lim2 = 1.0 / jnp.sqrt(hidden_dim)
    w1 = jax.random.uniform(kw1, (hidden_dim, input_dim), jnp.float32, -lim1, lim1)
    b1 = jax.random.uniform(kb1, (hidden_dim,), jnp.float32, -lim1, lim1)
    w2 = jax.random.uniform(kw2, (output_dim, hidden_dim), jnp.float32, -lim2, lim2)
    b2 = jax.random.uniform(kb2, (output_dim,), jnp.float32, -lim2, lim2)

    x = jax.random.normal(kx, (batch, input_dim), jnp.float32)

    # One-time parameter prep (transpose / pad / cast to bf16) — out of hot path.
    params = prepare_ffn_params(w1, b1, w2, b2)

    out = feed_forward(x, params)
    out = jax.block_until_ready(out)
    assert out.shape == (batch, output_dim)
    assert out.dtype == x.dtype

    # Strict check against a reference using the same bf16-MXU / f32-accumulate math.
    w1_t_bf = params["w1"][:, :hidden_dim]
    w2_t_bf = params["w2"][:hidden_dim, :output_dim]
    h_ref = jnp.maximum(
        jnp.dot(x.astype(jnp.bfloat16), w1_t_bf,
                preferred_element_type=jnp.float32) + b1, 0.0)
    ref_bf16 = jnp.dot(h_ref.astype(jnp.bfloat16), w2_t_bf,
                       preferred_element_type=jnp.float32) + b2
    assert jnp.allclose(out, ref_bf16, atol=1e-4, rtol=1e-4)

    # Loose check against the exact-f32 PyTorch forward (bf16 weight-rounding tolerance).
    ref_f32 = jnp.maximum(x @ w1.T + b1, 0.0) @ w2.T + b2
    assert jnp.allclose(out, ref_f32, atol=5e-2, rtol=5e-2)

    print("KERNEL_OK")
</pallas_src>

<mosaic_0001>
module attributes {stable_mosaic.version = 11 : i64} {
  func.func @_ffn_kernel_accum_out(%arg0: i32, %arg1: i32, %arg2: memref<8x16xf32, #tpu.memory_space<vmem>>, %arg3: memref<16x128xbf16, #tpu.memory_space<vmem>>, %arg4: memref<1x128xf32, #tpu.memory_space<vmem>>, %arg5: memref<128x128xbf16, #tpu.memory_space<vmem>>, %arg6: memref<1x128xf32, #tpu.memory_space<vmem>>, %arg7: memref<8x128xf32, #tpu.memory_space<vmem>>) attributes {dimension_semantics = [#tpu.dimension_semantics<parallel>, #tpu.dimension_semantics<arbitrary>], iteration_bounds = array<i64: 1, 1>, scalar_prefetch = 0 : i64, scratch_operands = 0 : i64, tpu.core_type = #tpu.core_type<tc>, window_params = [{transform_indices = @transform_0, window_bounds = array<i64: 8, 16>}, {transform_indices = @transform_1, window_bounds = array<i64: 16, 128>}, {transform_indices = @transform_2, window_bounds = array<i64: 1, 128>}, {transform_indices = @transform_3, window_bounds = array<i64: 128, 128>}, {pipeline_mode = #tpu.pipeline_mode<synchronous>, transform_indices = @transform_4, window_bounds = array<i64: 1, 128>}, {transform_indices = @transform_5, window_bounds = array<i64: 8, 128>}]} {
    %c0_i32 = arith.constant 0 : i32
    %0 = arith.cmpi eq, %arg1, %c0_i32 : i32
    %1 = arith.extui %0 : i1 to i32
    %c0_i32_0 = arith.constant 0 : i32
    %2 = arith.cmpi ne, %1, %c0_i32_0 : i32
    scf.if %2 {
      %cst_16 = arith.constant 0.000000e+00 : f32
      %21 = vector.broadcast %cst_16 : f32 to vector<8x128xf32>
      %c0_17 = arith.constant 0 : index
      %c0_18 = arith.constant 0 : index
      %22 = vector.load %arg7[%c0_17, %c0_18] : memref<8x128xf32, #tpu.memory_space<vmem>>, vector<8x128xf32>
      tpu.vector_store %arg7[%c0_17, %c0_18], %21 {strides = array<i32>} : memref<8x128xf32, #tpu.memory_space<vmem>>, vector<8x128xf32>,
    } else {
    }
    %c0 = arith.constant 0 : index
    %c0_1 = arith.constant 0 : index
    %3 = vector.load %arg2[%c0, %c0_1] : memref<8x16xf32, #tpu.memory_space<vmem>>, vector<8x16xf32>
    %4 = arith.truncf %3 : vector<8x16xf32> to vector<8x16xbf16>
    %c0_2 = arith.constant 0 : index
    %c0_3 = arith.constant 0 : index
    %5 = vector.load %arg3[%c0_2, %c0_3] : memref<16x128xbf16, #tpu.memory_space<vmem>>, vector<16x128xbf16>
    %cst = arith.constant dense<0.000000e+00> : vector<8x128xf32>
    %6 = tpu.matmul %4, %5, %cst {dimension_numbers = #tpu.dot_dimension_numbers<[1], [0], [0], [1], [0, 0, 1, 1], [], []>} : vector<8x16xbf16>, vector<16x128xbf16>, vector<8x128xf32> -> vector<8x128xf32>
    %c0_4 = arith.constant 0 : index
    %c0_5 = arith.constant 0 : index
    %7 = vector.load %arg4[%c0_4, %c0_5] : memref<1x128xf32, #tpu.memory_space<vmem>>, vector<1x128xf32>
    %8 = vector.broadcast %7 : vector<1x128xf32> to vector<8x128xf32>
    %9 = arith.addf %6, %8 : vector<8x128xf32>
    %cst_6 = arith.constant 0.000000e+00 : f32
    %10 = vector.broadcast %cst_6 : f32 to vector<8x128xf32>
    %11 = arith.maximumf %9, %10 : vector<8x128xf32>
    %c0_7 = arith.constant 0 : index
    %c0_8 = arith.constant 0 : index
    %12 = vector.load %arg7[%c0_7, %c0_8] : memref<8x128xf32, #tpu.memory_space<vmem>>, vector<8x128xf32>
    %13 = arith.truncf %11 : vector<8x128xf32> to vector<8x128xbf16>
    %c0_9 = arith.constant 0 : index
    %c0_10 = arith.constant 0 : index
    %14 = vector.load %arg5[%c0_9, %c0_10] : memref<128x128xbf16, #tpu.memory_space<vmem>>, vector<128x128xbf16>
    %cst_11 = arith.constant dense<0.000000e+00> : vector<8x128xf32>
    %15 = tpu.matmul %13, %14, %cst_11 {dimension_numbers = #tpu.dot_dimension_numbers<[1], [0], [0], [1], [0, 0, 1, 1], [], []>} : vector<8x128xbf16>, vector<128x128xbf16>, vector<8x128xf32> -> vector<8x128xf32>
    %16 = arith.addf %12, %15 : vector<8x128xf32>
    %c0_12 = arith.constant 0 : index
    %c0_13 = arith.constant 0 : index
    %17 = vector.load %arg7[%c0_12, %c0_13] : memref<8x128xf32, #tpu.memory_space<vmem>>, vector<8x128xf32>
    tpu.vector_store %arg7[%c0_12, %c0_13], %16 {strides = array<i32>} : memref<8x128xf32, #tpu.memory_space<vmem>>, vector<8x128xf32>,
    %c0_i32_14 = arith.constant 0 : i32
    %18 = arith.cmpi eq, %arg1, %c0_i32_14 : i32
    %19 = arith.extui %18 : i1 to i32
    %c0_i32_15 = arith.constant 0 : i32
    %20 = arith.cmpi ne, %19, %c0_i32_15 : i32
    scf.if %20 {
      %c0_16 = arith.constant 0 : index
      %c0_17 = arith.constant 0 : index
      %21 = vector.load %arg7[%c0_16, %c0_17] : memref<8x128xf32, #tpu.memory_space<vmem>>, vector<8x128xf32>
      %c0_18 = arith.constant 0 : index
      %c0_19 = arith.constant 0 : index
      %22 = vector.load %arg6[%c0_18, %c0_19] : memref<1x128xf32, #tpu.memory_space<vmem>>, vector<1x128xf32>
      %23 = vector.broadcast %22 : vector<1x128xf32> to vector<8x128xf32>
      %24 = arith.addf %21, %23 : vector<8x128xf32>
      %c0_20 = arith.constant 0 : index
      %c0_21 = arith.constant 0 : index
      %25 = vector.load %arg7[%c0_20, %c0_21] : memref<8x128xf32, #tpu.memory_space<vmem>>, vector<8x128xf32>
      tpu.vector_store %arg7[%c0_20, %c0_21], %24 {strides = array<i32>} : memref<8x128xf32, #tpu.memory_space<vmem>>, vector<8x128xf32>,
    } else {
    }
    return
  }
  func.func @transform_0(%arg0: i32, %arg1: i32) -> (i32, i32) {
    %c0_i32 = arith.constant 0 : i32
    %c0_i32_0 = arith.constant 0 : i32
    return %arg0, %c0_i32 : i32, i32
  }
  func.func @transform_1(%arg0: i32, %arg1: i32) -> (i32, i32) {
    %c0_i32 = arith.constant 0 : i32
    %c0_i32_0 = arith.constant 0 : i32
    return %c0_i32, %arg1 : i32, i32
  }
  func.func @transform_2(%arg0: i32, %arg1: i32) -> (i32, i32) {
    %c0_i32 = arith.constant 0 : i32
    %c0_i32_0 = arith.constant 0 : i32
    return %c0_i32, %arg1 : i32, i32
  }
  func.func @transform_3(%arg0: i32, %arg1: i32) -> (i32, i32) {
    %c0_i32 = arith.constant 0 : i32
    %c0_i32_0 = arith.constant 0 : i32
    return %arg1, %c0_i32 : i32, i32
  }
  func.func @transform_4(%arg0: i32, %arg1: i32) -> (i32, i32) {
    %c0_i32 = arith.constant 0 : i32
    %c0_i32_0 = arith.constant 0 : i32
    %c0_i32_1 = arith.constant 0 : i32
    return %c0_i32, %c0_i32_0 : i32, i32
  }
  func.func @transform_5(%arg0: i32, %arg1: i32) -> (i32, i32) {
    %c0_i32 = arith.constant 0 : i32
    %c0_i32_0 = arith.constant 0 : i32
    return %arg0, %c0_i32 : i32, i32
  }
}

</mosaic_0001>

<bundles_post_ra>
// kernel: _ffn_pallas.1
= control target key start
LH: loop header
LB: loop body
LE: loop exit
PB: predicated region body
PF: predicated region fallthrough
CT: control target
= control target key end

     0   :  { %10 = vsyncpa [#allocation3], 0  ;;  %s424_s0 = inlined_call_operand.hbm [shape: f32[8,16], index: 0, kind: input, shape index: {}]   ;;  %s425_s1 = inlined_call_operand.hbm [shape: bf16[16,128], index: 1, kind: input, shape index: {}]   ;;  %s426_s2 = inlined_call_operand.vmem [shape: f32[1,128], index: 2, kind: input, shape index: {}]   ;;  %s427_s3 = inlined_call_operand.hbm [shape: bf16[128,128], index: 3, kind: input, shape index: {}]   ;;  %s428_s4 = inlined_call_operand.vmem [shape: f32[1,128], index: 4, kind: input, shape index: {}]   ;;  %s429_s5 = inlined_call_operand.hbm [shape: f32[8,128], index: 5, kind: output, shape index: {}]  }
   0x1   :  { %11 = vsyncpa [#allocation6], 0  ;;  %s28_s20 = sshll.u32 %s425_s1, 4  ;;  %s29_s20 = int_to_ptr.hbm [resolvable:$true] %s28_s20 }
   0x2   :  { %12 = vsyncpa [#allocation4], 0  ;;  %s370_s21 = smov [#allocation5]   ;;  %s18_s25 = sshll.u32 %s424_s0, 4  ;;  %s19_s25 = int_to_ptr.hbm [resolvable:$true] %s18_s25 }
   0x3   :  { %s30_s22 = sshll.u32 %s370_s21, 4  ;;  %s371_s26 = smov 64   ;;  %s31_s22 = int_to_ptr.vmem [resolvable:$true] %s30_s22 }
   0x4   :  { %s372_s27 = smov 4   ;;  %s373_s28 = smov [#allocation2]  }
   0x5   :  { %36 = dma.hbm_to_vmem [thread:$0]  %s29_s20, 128, %s31_s22, [#allocation6], %s371_s26, %s371_s26, %s372_s27  }
   0x6   :  { %s20_s29 = sshll.u32 %s373_s28, 4  ;;  %s43_s7 = sshll.u32 %s427_s3, 4  ;;  %s21_s29 = int_to_ptr.vmem [resolvable:$true] %s20_s29  ;;  %s44_s7 = int_to_ptr.hbm [resolvable:$true] %s43_s7 }
   0x7   :  { %23 = dma.hbm_to_vmem [thread:$0]  %s19_s25, 128, %s21_s29, [#allocation3]  }
   0x8   :  { %s374_s1 = smov [#allocation7]  }
   0x9   :  { %s45_s8 = sshll.u32 %s374_s1, 4  ;;  %s46_s8 = int_to_ptr.vmem [resolvable:$true] %s45_s8 }
   0xa   :  { %51 = dma.hbm_to_vmem [thread:$0]  %s44_s7, 1024, %s46_s8, [#allocation6], %s371_s26, %s371_s26, %s372_s27  }
   0xb   :  { %364 = dma.done.wait [#allocation3], 128  }
   0xc   :  { %365 = vsyncadd [#allocation3], 4294967168 }
   0xd   :  { %366 = dma.done.wait [#allocation6], 1152  }
   0xe   :  { %367 = vsyncadd [#allocation6], 4294966144  ;;  %v250_v0 = vld [vmem:[#allocation5] sm:$0xff]  ;;  %v72_v1 = vld [vmem:[#allocation2] sm:$0xff]  ;;  %vm86_vm0 = vcmask 130048   ;;  %s375_s11 = smov [#allocation8]  }
   0xf   :  { %v258_v2 = vld [vmem:[#allocation7 + $0x38] sm:$0xff]  ;;  %v73_v3 = vpack.c.bf16 %v72_v1, %v72_v1  ;;  %97 = vmatpush.bf16.msra.mxu0 %v250_v0  ;;  %v257_v4 = vld [vmem:[#allocation7 + $0x30] sm:$0xff]  ;;  %v256_v5 = vld [vmem:[#allocation7 + $0x28] sm:$0xff]  ;;  %s200_s12 = sshll.u32 %s375_s11, 4  ;;  %s202_s15 = sshll.u32 %s429_s5, 4  ;;  %s201_s12 = int_to_ptr.vmem [resolvable:$true] %s200_s12  ;;  %s203_s15 = int_to_ptr.hbm [resolvable:$true] %s202_s15 }
  0x10   :  { %170 = vmatpush.bf16.msra.mxu1 %v258_v2  ;;  %v255_v6 = vld [vmem:[#allocation7 + $0x20] sm:$0xff]  ;;  %v254_v7 = vld [vmem:[#allocation7 + $0x18] sm:$0xff]  ;;  %v253_v8 = vld [vmem:[#allocation7 + $0x10] sm:$0xff] }
  0x11   :  { %v252_v9 = vld [vmem:[#allocation7 + $0x8] sm:$0xff]  ;;  %v251_v10 = vld [vmem:[#allocation7] sm:$0xff]  ;;  %v266_v11 = vld [vmem:[%s426_s2] ss:$0 sm:$0xff] }
  0x12   :  { %217 = vmatmul.msk.bf16.vlgmr.msra.gmra.mxu0 %vm86_vm0, %v73_v3  ;;  %v267_v17 = vld [vmem:[%s428_s4] ss:$0 sm:$0xff] }
  0x14   :  { %171 = vmatpush.bf16.msra.mxu1 %v257_v4 }
  0x18   :  { %172 = vmatpush.bf16.msra.mxu1 %v256_v5 }
  0x1c   :  { %173 = vmatpush.bf16.msra.mxu1 %v255_v6 }
  0x20   :  { %174 = vmatpush.bf16.msra.mxu1 %v254_v7 }
  0x24   :  { %175 = vmatpush.bf16.msra.mxu1 %v253_v8 }
  0x28   :  { %176 = vmatpush.bf16.msra.mxu1 %v252_v9 }
  0x2c   :  { %177 = vmatpush.bf16.msra.mxu1 %v251_v10 }
  0x8f   :  { %v99_v12 = vpop.f32.mrf.mxu0 }
  0x90   :  { %v100_v13 = vadd.f32 %v266_v11, %v99_v12 }
  0x92   :  { %v103_v14 = vmax.f32 %v100_v13, 0.0 }
  0x94   :  { %v105_v15 = vpack.c.bf16 %v103_v14, %v103_v14 }
  0x96   :  { %178 = vmatmul.bf16.vlgmr.msra.gmra.mxu1 %v105_v15 }
  0x97   :  { %v101_v16 = vpop.f32.mrf.mxu0 }
 0x113   :  { %v179_v18 = vpop.f32.mrf.mxu1 }
 0x114   :  { %v193_v19 = vadd.f32 %v267_v17, %v179_v18 }
 0x116   :  { %194 = vst [vmem:[#allocation8] sm:$0xff] %v193_v19 }
 0x117   :  { %205 = dma.vmem_to_hbm [thread:$0]  %s201_s12, 128, %s203_s15, [#allocation4]  }
 0x11b   :  { %v181_v20 = vpop.f32.mrf.mxu1 }
 0x11c   :  { %368 = dma.done.wait [#allocation4], 128  }
 0x11d   :  { %369 = vsyncadd [#allocation4], 4294967168 }
 0x11e   :  { %210 = vsyncpa [#allocation3], 1 }
 0x11f   :  { %211 = vsyncpa [#allocation6], 1 }
 0x120   :  { %212 = vsyncpa [#allocation4], 1 }

</bundles_post_ra>
